<compile_context>
chip_gen: v6e
topology: v6e:2x2x1
jax: 0.10.0
libtpu: 0.0.40
codegen_flags: <defaults>
</compile_context>

<pallas_src>
import functools

import jax
import jax.numpy as jnp
from jax.experimental import pallas as pl
from jax.experimental.pallas import tpu as pltpu


def _recurrent_gcn_kernel(xt_ref, wg_ref, bg_ref, wl_ref, bl_ref, out_ref, *, hidden):
    # xt: [F, TN] (bf16/f32) node-column tile of x^T
    # wg: [2H, F] packed [Wxz^T ; Wxh^T], bg: [2H, 1] f32 folded biases
    # wl: [1, H] head weight^T,           bl: [1, 1] f32 head bias
    xt = xt_ref[...]
    wg = wg_ref[...]

    # One fused gate matmul (f32 accumulation on the MXU) + folded biases.
    # preact^T : [2H, TN]
    preact = jnp.dot(wg, xt, preferred_element_type=jnp.float32) + bg_ref[...]

    z = jax.nn.sigmoid(preact[:hidden, :])        # update gate      [H, TN]
    h_tilde = jnp.tanh(preact[hidden:, :])        # candidate state  [H, TN]
    h_new = (1.0 - z) * h_tilde                   # H=0  =>  Z*H == 0

    # Head: ReLU + Linear(hidden -> 1), computed transposed so the store is a
    # lane-dense [1, TN] row (no padded output columns).
    y = jnp.maximum(h_new, 0.0).astype(wl_ref.dtype)
    out_ref[...] = jnp.dot(wl_ref[...], y, preferred_element_type=jnp.float32) + bl_ref[...]


def recurrent_gcn_forward(x, edge_index, edge_weight, params, hidden_features,
                          *, node_tile=1024, use_bf16=True):
    # edge_index / edge_weight are part of the reference signature but unused
    # for ChebConv with K=1 (no Laplacian propagation term).
    del edge_index, edge_weight
    n, f = x.shape
    h = hidden_features
    mm_dtype = jnp.bfloat16 if use_bf16 else jnp.float32

    # --- host-side weight packing (feature-major / transposed) --------------
    # Fused gate weight [2H, F] = [Wxz^T ; Wxh^T]; biases folded per gate.
    wg_t = jnp.concatenate([params["wxz"].T, params["wxh"].T], axis=0).astype(mm_dtype)
    bg_t = jnp.concatenate([(params["bxz"] + params["bhz"]).T,
                            (params["bxh"] + params["bhh"]).T], axis=0)   # [2H, 1] f32
    wl_t = params["wl"].T.astype(mm_dtype)                                # [1, H]
    bl = params["bl"].astype(jnp.float32)                                 # [1, 1]

    # --- node tiling (lane dimension of x^T) ---------------------------------
    n128 = pl.cdiv(n, 128) * 128
    tile = min(node_tile, n128)
    n_tiles = pl.cdiv(n, tile)
    if n_tiles == 1 and tile > 128:
        # Split into >=2 tiles so v7x's second TensorCore gets work.
        tile = max(128, pl.cdiv(tile // 2, 128) * 128)
        n_tiles = pl.cdiv(n, tile)
    n_pad = n_tiles * tile

    # Single pass over x: cast to matmul dtype, transpose (F=8 is cheap), pad
    # the node/lane dimension once.
    x_t = jnp.pad(x.astype(mm_dtype).T, ((0, 0), (0, n_pad - n)))         # [F, n_pad]

    itemsize = jnp.dtype(mm_dtype).itemsize
    cost = pl.CostEstimate(
        flops=2 * n_pad * f * (2 * h) + 2 * n_pad * h,
        transcendentals=2 * n_pad * h,                        # sigmoid + tanh
        bytes_accessed=(f * n_pad * itemsize                  # x^T
                        + 2 * h * f * itemsize                # gate weights
                        + h * itemsize                        # head weight
                        + (2 * h + 1) * 4                     # biases
                        + n_pad * 4),                         # output row
    )

    out = pl.pallas_call(
        functools.partial(_recurrent_gcn_kernel, hidden=h),
        out_shape=jax.ShapeDtypeStruct((1, n_pad), jnp.float32),
        grid=(n_tiles,),
        in_specs=[
            pl.BlockSpec((f, tile), lambda i: (0, i)),        # x^T node-column tiles
            pl.BlockSpec((2 * h, f), lambda i: (0, 0)),       # gate W (resident)
            pl.BlockSpec((2 * h, 1), lambda i: (0, 0)),       # gate b (resident)
            pl.BlockSpec((1, h), lambda i: (0, 0)),           # head W (resident)
            pl.BlockSpec((1, 1), lambda i: (0, 0)),           # head b (resident)
        ],
        out_specs=pl.BlockSpec((1, tile), lambda i: (0, i)),  # lane-dense [1, TN] row
        compiler_params=pltpu.CompilerParams(
            dimension_semantics=("parallel",)),
        cost_estimate=cost,
    )(x_t, wg_t, bg_t, wl_t, bl)

    return out[0, :n].reshape(n, 1)


def init_params(key, node_features, hidden_features):
    """Deterministic init mirroring PyG defaults: glorot weights, zero ChebConv
    biases, uniform init for the final Linear head. Weights are [in, out]."""
    F, H = node_features, hidden_features
    keys = jax.random.split(key, 8)

    def glorot(k, fan_in, fan_out):
        lim = (6.0 / (fan_in + fan_out)) ** 0.5
        return jax.random.uniform(k, (fan_in, fan_out), jnp.float32, -lim, lim)

    zeros_b = lambda d: jnp.zeros((1, d), jnp.float32)
    lin_lim = 1.0 / (H ** 0.5)
    return {
        "wxz": glorot(keys[0], F, H), "bxz": zeros_b(H),
        "whz": glorot(keys[1], H, H), "bhz": zeros_b(H),
        "wxr": glorot(keys[2], F, H), "bxr": zeros_b(H),
        "whr": glorot(keys[3], H, H), "bhr": zeros_b(H),
        "wxh": glorot(keys[4], F, H), "bxh": zeros_b(H),
        "whh": glorot(keys[5], H, H), "bhh": zeros_b(H),
        "wl": jax.random.uniform(keys[6], (H, 1), jnp.float32, -lin_lim, lin_lim),
        "bl": jax.random.uniform(keys[7], (1, 1), jnp.float32, -lin_lim, lin_lim),
    }


def _reference_forward(x, params):
    """Pure-JAX f32 reference of the full GConvGRU(K=1) cell + head with H=None
    (validates the algebraic specialization used inside the kernel)."""
    h0 = jnp.zeros((x.shape[0], params["whz"].shape[0]), jnp.float32)
    z = jax.nn.sigmoid(x @ params["wxz"] + params["bxz"] + h0 @ params["whz"] + params["bhz"])
    r = jax.nn.sigmoid(x @ params["wxr"] + params["bxr"] + h0 @ params["whr"] + params["bhr"])
    h_t = jnp.tanh(x @ params["wxh"] + params["bxh"] + (h0 * r) @ params["whh"] + params["bhh"])
    h_new = z * h0 + (1.0 - z) * h_t
    return jnp.maximum(h_new, 0.0) @ params["wl"] + params["bl"]


if __name__ == "__main__":
    node_features, hidden_features = 8, 32
    key = jax.random.PRNGKey(0)
    kx, ke, kw, kp, kx2 = jax.random.split(key, 5)
    params = init_params(kp, node_features, hidden_features)

    # Small shape matching the spec harness (single node-tile path).
    num_nodes, num_edges = 16, 32
    x = jax.random.normal(kx, (num_nodes, node_features), jnp.float32)
    edge_index = jax.random.randint(ke, (2, num_edges), 0, num_nodes, dtype=jnp.int32)
    edge_weight = jax.random.uniform(kw, (num_edges,), jnp.float32)

    y = recurrent_gcn_forward(x, edge_index, edge_weight, params, hidden_features)
    y = jax.block_until_ready(y)
    assert y.shape == (num_nodes, 1)
    assert bool(jnp.all(jnp.isfinite(y)))
    y_ref = _reference_forward(x, params)
    assert jnp.allclose(y, y_ref, atol=3e-2, rtol=3e-2), float(jnp.max(jnp.abs(y - y_ref)))

    # Ragged multi-tile path (exercises >=2 node tiles / megacore split).
    n2 = 300
    x2 = jax.random.normal(kx2, (n2, node_features), jnp.float32)
    y2 = jax.block_until_ready(
        recurrent_gcn_forward(x2, edge_index, edge_weight, params, hidden_features))
    assert y2.shape == (n2, 1)
    y2_ref = _reference_forward(x2, params)
    assert jnp.allclose(y2, y2_ref, atol=3e-2, rtol=3e-2), float(jnp.max(jnp.abs(y2 - y2_ref)))

    print("KERNEL_OK")
</pallas_src>

<mosaic_0001>
module attributes {stable_mosaic.version = 11 : i64} {
  func.func @_recurrent_gcn_kernel(%arg0: i32, %arg1: memref<8x128xbf16, #tpu.memory_space<vmem>>, %arg2: memref<64x8xbf16, #tpu.memory_space<vmem>>, %arg3: memref<64x1xf32, #tpu.memory_space<vmem>>, %arg4: memref<1x32xbf16, #tpu.memory_space<vmem>>, %arg5: memref<1x1xf32, #tpu.memory_space<vmem>>, %arg6: memref<1x128xf32, #tpu.memory_space<vmem>>) attributes {dimension_semantics = [#tpu.dimension_semantics<parallel>], iteration_bounds = array<i64: 1>, scalar_prefetch = 0 : i64, scratch_operands = 0 : i64, tpu.core_type = #tpu.core_type<tc>, window_params = [{transform_indices = @transform_0, window_bounds = array<i64: 8, 128>}, {pipeline_mode = #tpu.pipeline_mode<synchronous>, transform_indices = @transform_1, window_bounds = array<i64: 64, 8>}, {pipeline_mode = #tpu.pipeline_mode<synchronous>, transform_indices = @transform_2, window_bounds = array<i64: 64, 1>}, {pipeline_mode = #tpu.pipeline_mode<synchronous>, transform_indices = @transform_3, window_bounds = array<i64: 1, 32>}, {pipeline_mode = #tpu.pipeline_mode<synchronous>, transform_indices = @transform_4, window_bounds = array<i64: 1, 1>}, {transform_indices = @transform_5, window_bounds = array<i64: 1, 128>}]} {
    %c0 = arith.constant 0 : index
    %c0_0 = arith.constant 0 : index
    %0 = vector.load %arg1[%c0, %c0_0] : memref<8x128xbf16, #tpu.memory_space<vmem>>, vector<8x128xbf16>
    %c0_1 = arith.constant 0 : index
    %c0_2 = arith.constant 0 : index
    %1 = vector.load %arg2[%c0_1, %c0_2] : memref<64x8xbf16, #tpu.memory_space<vmem>>, vector<64x8xbf16>
    %cst = arith.constant dense<0.000000e+00> : vector<64x128xf32>
    %2 = tpu.matmul %1, %0, %cst {dimension_numbers = #tpu.dot_dimension_numbers<[1], [0], [0], [1], [0, 0, 1, 1], [], []>} : vector<64x8xbf16>, vector<8x128xbf16>, vector<64x128xf32> -> vector<64x128xf32>
    %c0_3 = arith.constant 0 : index
    %c0_4 = arith.constant 0 : index
    %3 = vector.load %arg3[%c0_3, %c0_4] : memref<64x1xf32, #tpu.memory_space<vmem>>, vector<64x1xf32>
    %4 = vector.broadcast %3 : vector<64x1xf32> to vector<64x128xf32>
    %5 = arith.addf %2, %4 : vector<64x128xf32>
    %6 = vector.extract_strided_slice %5 {offsets = [0, 0], sizes = [32, 128], strides = [1, 1]} : vector<64x128xf32> to vector<32x128xf32>
    %7 = arith.negf %6 : vector<32x128xf32>
    %8 = math.exp %7 : vector<32x128xf32>
    %cst_5 = arith.constant 1.000000e+00 : f32
    %9 = vector.broadcast %cst_5 : f32 to vector<32x128xf32>
    %10 = arith.addf %9, %8 : vector<32x128xf32>
    %11 = arith.divf %9, %10 : vector<32x128xf32>
    %12 = vector.extract_strided_slice %5 {offsets = [32, 0], sizes = [32, 128], strides = [1, 1]} : vector<64x128xf32> to vector<32x128xf32>
    %13 = math.tanh %12 : vector<32x128xf32>
    %cst_6 = arith.constant 1.000000e+00 : f32
    %14 = vector.broadcast %cst_6 : f32 to vector<32x128xf32>
    %15 = arith.subf %14, %11 : vector<32x128xf32>
    %16 = arith.mulf %15, %13 : vector<32x128xf32>
    %cst_7 = arith.constant 0.000000e+00 : f32
    %17 = vector.broadcast %cst_7 : f32 to vector<32x128xf32>
    %18 = arith.maximumf %16, %17 : vector<32x128xf32>
    %19 = arith.truncf %18 : vector<32x128xf32> to vector<32x128xbf16>
    %c0_8 = arith.constant 0 : index
    %c0_9 = arith.constant 0 : index
    %20 = vector.load %arg4[%c0_8, %c0_9] : memref<1x32xbf16, #tpu.memory_space<vmem>>, vector<1x32xbf16>
    %cst_10 = arith.constant dense<0.000000e+00> : vector<1x128xf32>
    %21 = tpu.matmul %20, %19, %cst_10 {dimension_numbers = #tpu.dot_dimension_numbers<[1], [0], [0], [1], [0, 0, 1, 1], [], []>} : vector<1x32xbf16>, vector<32x128xbf16>, vector<1x128xf32> -> vector<1x128xf32>
    %c0_11 = arith.constant 0 : index
    %c0_12 = arith.constant 0 : index
    %22 = vector.load %arg5[%c0_11, %c0_12] : memref<1x1xf32, #tpu.memory_space<vmem>>, vector<1x1xf32>
    %23 = vector.broadcast %22 : vector<1x1xf32> to vector<1x128xf32>
    %24 = arith.addf %21, %23 : vector<1x128xf32>
    %c0_13 = arith.constant 0 : index
    %c0_14 = arith.constant 0 : index
    %25 = vector.load %arg6[%c0_13, %c0_14] : memref<1x128xf32, #tpu.memory_space<vmem>>, vector<1x128xf32>
    tpu.vector_store %arg6[%c0_13, %c0_14], %24 {strides = array<i32>} : memref<1x128xf32, #tpu.memory_space<vmem>>, vector<1x128xf32>,
    return
  }
  func.func @transform_0(%arg0: i32) -> (i32, i32) {
    %c0_i32 = arith.constant 0 : i32
    %c0_i32_0 = arith.constant 0 : i32
    return %c0_i32, %arg0 : i32, i32
  }
  func.func @transform_1(%arg0: i32) -> (i32, i32) {
    %c0_i32 = arith.constant 0 : i32
    %c0_i32_0 = arith.constant 0 : i32
    %c0_i32_1 = arith.constant 0 : i32
    return %c0_i32, %c0_i32_0 : i32, i32
  }
  func.func @transform_2(%arg0: i32) -> (i32, i32) {
    %c0_i32 = arith.constant 0 : i32
    %c0_i32_0 = arith.constant 0 : i32
    %c0_i32_1 = arith.constant 0 : i32
    return %c0_i32, %c0_i32_0 : i32, i32
  }
  func.func @transform_3(%arg0: i32) -> (i32, i32) {
    %c0_i32 = arith.constant 0 : i32
    %c0_i32_0 = arith.constant 0 : i32
    %c0_i32_1 = arith.constant 0 : i32
    return %c0_i32, %c0_i32_0 : i32, i32
  }
  func.func @transform_4(%arg0: i32) -> (i32, i32) {
    %c0_i32 = arith.constant 0 : i32
    %c0_i32_0 = arith.constant 0 : i32
    %c0_i32_1 = arith.constant 0 : i32
    return %c0_i32, %c0_i32_0 : i32, i32
  }
  func.func @transform_5(%arg0: i32) -> (i32, i32) {
    %c0_i32 = arith.constant 0 : i32
    %c0_i32_0 = arith.constant 0 : i32
    return %c0_i32, %arg0 : i32, i32
  }
}

</mosaic_0001>

<bundles_post_ra>
// kernel: tpu_custom_call.1
= control target key start
LH: loop header
LB: loop body
LE: loop exit
PB: predicated region body
PF: predicated region fallthrough
CT: control target
= control target key end

     0   :  { %s480_s0 = inlined_call_operand.vmem [shape: bf16[8,128], index: 0, kind: input, shape index: {}]   ;;  %s481_s1 = inlined_call_operand.vmem [shape: bf16[64,8], index: 1, kind: input, shape index: {}]   ;;  %s482_s2 = inlined_call_operand.vmem [shape: f32[64,1], index: 2, kind: input, shape index: {}]   ;;  %s483_s3 = inlined_call_operand.vmem [shape: bf16[1,32], index: 3, kind: input, shape index: {}]   ;;  %s484_s4 = inlined_call_operand.<no memory space> [shape: f32[1,1], index: 4, kind: input, shape index: {}]   ;;  %s485_s5 = inlined_call_operand.hbm [shape: f32[1,128], index: 5, kind: output, shape index: {}]  }
   0x1   :  { %v10_v0 = vstv %s484_s4 }
   0x2   :  { %11 = vst [vmem:[#allocation2] sm:$0x1] %v10_v0 }
   0x3   :  { %v24_v1 = vld [vmem:[%s480_s0] sm:$0xf]  ;;  %vm114_vm0 = vcmask 1043456   ;;  %vm101_vm1 = vcmask 64512   ;;  %v342_v4 = vld [vmem:[%s481_s1 + $0x8] sm:$0xff]   ;;  %v343_v5 = vld [vmem:[%s481_s1 + $0x10] sm:$0xff]  }
   0x4   :  { %v341_v2 = vld [vmem:[%s481_s1] sm:$0xff]   ;;  %334 = vmatprep.subr.msk.bf16.mxu0 %vm114_vm0, %v24_v1  ;;  %v116_v3 = vsel %vm114_vm0, %v24_v1, 0  ;;  %v391_v6 = vmov 0   ;;  %v35_v7 = vld [vmem:[%s482_s2 + $0x10] sm:$0xff]  ;;  %v36_v9 = vld [vmem:[%s482_s2 + $0x18] sm:$0xff] }
   0x5   :  { %317 = vmatpush3.bf16.msra.mxu0 %v116_v3  ;;  %318 = vmatprep.mubr.msk.bf16.mxu0 %vm101_vm1, %v341_v2  ;;  %v33_v8 = vld [vmem:[%s482_s2] sm:$0xff]  ;;  %v34_v10 = vld [vmem:[%s482_s2 + $0x8] sm:$0xff] }
   0x6   :  { %339 = vset.pattern.permute.xlu0 %v391_v6  ;;  %340 = vset.pattern.permute.xlu1 %v391_v6 }
   0x7   :  { %53 = vperm.xlu0 %339, %v35_v7   ;;  %43 = vperm.xlu1 %340, %v33_v8  }
   0x8   :  { %319 = vmatmul.mubr.msk.bf16.vlgmr.msra.gmra.mxu0 %vm101_vm1, %v342_v4 }
   0x9   :  { %322 = vmatprep.mubr.msk.bf16.mxu0 %vm101_vm1, %v343_v5 }
   0xa   :  { %12 = vsyncpa [#allocation4], 0  ;;  %v344_v11 = vld [vmem:[%s481_s1 + $0x18] sm:$0xff]   ;;  %v39_v12 = vld [vmem:[%s482_s2 + $0x30] sm:$0xff]  ;;  %v392_v17 = vmov 0.0   ;;  %vm393_vm2 = vmmov 0  }
   0xb   :  { %58 = vperm.xlu0 %339, %v36_v9   ;;  %48 = vperm.xlu1 %340, %v34_v10   ;;  %v40_v13 = vld [vmem:[%s482_s2 + $0x38] sm:$0xff]  ;;  %v37_v14 = vld [vmem:[%s482_s2 + $0x20] sm:$0xff]  ;;  %v38_v15 = vld [vmem:[%s482_s2 + $0x28] sm:$0xff]  ;;  %vm236_vm3 = vcmask 261120   ;;  %s394_s19 = smov [#allocation3]  }
   0xc   :  { %v226_v16 = vld [vmem:[#allocation2] sm:$0x1]  ;;  %326 = vmatprep.subr.bf16.mxu1 %v392_v17  ;;  %330 = vmatprep.mubr.msk.bf16.mxu1 %vm393_vm2, %v392_v17  ;;  %s287_s20 = sshll.u32 %s394_s19, 4  ;;  %s288_s20 = int_to_ptr.vmem [resolvable:$true] %s287_s20 }
   0xd   :  { %s369_s21 = scalar_lea.vmem %s288_s20, 16  ;;  %s373_s22 = scalar_lea.vmem %s288_s20, 32 }
   0xe   :  { %p370_p0 = scmp.ne.s32.totalorder %s288_s20, %s369_s21  ;;  %p374_p1 = scmp.lt.s32.totalorder %s288_s20, %s288_s20 }
   0xf   :  { %73 = vperm.xlu0 %339, %v39_v12   ;;  %78 = vperm.xlu1 %340, %v40_v13   ;;  %v225_v12 = vld [vmem:[%s483_s3] sm:$0x1]  ;;  %v232_v13 = vlaneseq  ;;  %p375_p2 = scmp.lt.s32.totalorder %s373_s22, %s369_s21 }
  0x10   :  { %323 = vmatmul.mubr.msk.bf16.gmra.mxu0 %vm101_vm1, %v344_v11 }
  0x11   :  { %p376_p3 = por %p375_p2, %p374_p1 }
  0x13   :  { %63 = vperm.xlu0 %339, %v37_v14   ;;  %68 = vperm.xlu1 %340, %v38_v15   ;;  %v233_v14 = vshrl.u32 %v232_v13, 7  ;;  %p377_p4 = pnand %p376_p3, %p370_p0 }
  0x15   :  { %v234_v15 = vsub.s32 0, %v233_v14 }
  0x17   :  { %229 = vperm.xlu0 %339, %v226_v16  }
  0x82   :  { %v54_v18 = vpop.permute.xlu0 %53  ;;  %v44_v19 = vpop.permute.xlu1 %43 }
  0x86   :  { %v59_v25 = vpop.permute.xlu0 %58  ;;  %v49_v29 = vpop.permute.xlu1 %48 }
  0x8a   :  { %v74_v36 = vpop.permute.xlu0 %73  ;;  %v79_v38 = vpop.permute.xlu1 %78 }
  0x8e   :  { %v64_v47 = vpop.permute.xlu0 %63  ;;  %v69_v50 = vpop.permute.xlu1 %68 }
  0x92   :  { %v230_v16 = vpop.permute.xlu0 %229 }
  0xc8   :  { %v320_v20 = vpop.f32.mrf.mxu0 }
  0xc9   :  { %v161_v21 = vadd.f32 %v320_v20, %v54_v18  ;;  %v235_v18 = vrot.slane %v230_v16, %v234_v15 }
  0xca   :  { %v152_v22 = vpop.f32.mrf.mxu0 }
  0xcb   :  { %v305_v23 = vmul.f32 -1.442695, %v161_v21  ;;  %v153_v24 = vadd.f32 %v152_v22, %v44_v19 }
  0xcc   :  { %v321_v26 = vpop.f32.mrf.mxu0 }
  0xcd   :  { %345 = vpow2.f32 %v305_v23  ;;  %v303_v27 = vmul.f32 -1.442695, %v153_v24  ;;  %v164_v28 = vadd.f32 %v321_v26, %v59_v25 }
  0xce   :  { %v155_v30 = vpop.f32.mrf.mxu0 }
  0xcf   :  { %347 = vpow2.f32 %v303_v27  ;;  %v306_v31 = vmul.f32 -1.442695, %v164_v28  ;;  %v156_v32 = vadd.f32 %v155_v30, %v49_v29 }
  0xd0   :  { %v324_v34 = vpop.f32.mrf.mxu0 }
  0xd1   :  { %349 = vpow2.f32 %v306_v31  ;;  %v304_v33 = vmul.f32 -1.442695, %v156_v32  ;;  %v177_v42 = vadd.f32 %v324_v34, %v74_v36 }
  0xd2   :  { %v168_v35 = vpop.f32.mrf.mxu0 }
  0xd3   :  { %351 = vpow2.f32 %v304_v33  ;;  %v169_v51 = vadd.f32 %v168_v35, %v64_v47 }
  0xd4   :  { %v325_v39 = vpop.f32.mrf.mxu0 }
  0xd5   :  { %v180_v45 = vadd.f32 %v325_v39, %v79_v38 }
  0xd6   :  { %v171_v46 = vpop.f32.mrf.mxu0 }
  0xd7   :  { %v172_v53 = vadd.f32 %v171_v46, %v69_v50 }
  0xda   :  { %v346_v37 = vpop.eup %345 }
  0xdb   :  { %v197_v40 = vadd.f32 1.0, %v346_v37 }
  0xdc   :  { %v348_v41 = vpop.eup %347 }
  0xdd   :  { %353 = vrcp.f32 %v197_v40  ;;  %v195_v43 = vadd.f32 1.0, %v348_v41 }
  0xde   :  { %v350_v44 = vpop.eup %349 }
  0xdf   :  { %355 = vrcp.f32 %v195_v43  ;;  %v198_v48 = vadd.f32 1.0, %v350_v44 }
  0xe0   :  { %v352_v49 = vpop.eup %351  ;;  %357 = vtanh.f32 %v177_v42 }
  0xe1   :  { %359 = vrcp.f32 %v198_v48  ;;  %v196_v52 = vadd.f32 1.0, %v352_v49 }
  0xe2   :  { %361 = vtanh.f32 %v180_v45 }
  0xe3   :  { %363 = vrcp.f32 %v196_v52 }
  0xe4   :  { %365 = vtanh.f32 %v169_v51 }
  0xe5   :  { %367 = vtanh.f32 %v172_v53 }
  0xea   :  { %v354_v54 = vpop.eup %353 }
  0xeb   :  { %v213_v55 = vsub.f32 1.0, %v354_v54 }
  0xec   :  { %v356_v56 = vpop.eup %355 }
  0xed   :  { %v358_v57 = vpop.eup %357  ;;  %v211_v62 = vsub.f32 1.0, %v356_v56 }
  0xee   :  { %v360_v58 = vpop.eup %359  ;;  %v217_v61 = vmul.f32 %v358_v57, %v213_v55 }
  0xef   :  { %v362_v59 = vpop.eup %361  ;;  %v214_v60 = vsub.f32 1.0, %v360_v58 }
  0xf0   :  { %v364_v63 = vpop.eup %363  ;;  %v221_v4 = vmax.f32 %v217_v61, 0.0 }
  0xf1   :  { %v366_v0 = vpop.eup %365  ;;  %v218_v1 = vmul.f32 %v362_v59, %v214_v60  ;;  %v212_v2 = vsub.f32 1.0, %v364_v63 }
  0xf2   :  { %v368_v3 = vpop.eup %367  ;;  %v215_v6 = vmul.f32 %v366_v0, %v211_v62 }
  0xf3   :  { %v222_v5 = vmax.f32 %v218_v1, 0.0  ;;  %v216_v7 = vmul.f32 %v368_v3, %v212_v2 }
  0xf4   :  { %v219_v10 = vmax.f32 %v215_v6, 0.0 }
  0xf5   :  { %v224_v8 = vpack.c.bf16 %v222_v5, %v221_v4  ;;  %v220_v9 = vmax.f32 %v216_v7, 0.0 }
  0xf7   :  { %327 = vmatpush3.bf16.msra.mxu1 %v224_v8  ;;  %v223_v11 = vpack.c.bf16 %v220_v9, %v219_v10 }
  0xf8   :  { %328 = vmatprep.subr.bf16.mxu1 %v392_v17 }
  0xfb   :  { %329 = vmatpush3.bf16.msra.mxu1 %v223_v11 }
  0xfe   :  { %331 = vmatmul.mubr.msk.bf16.vlgmr.msra.gmra.mxu1 %vm236_vm3, %v225_v12 }
 0x1be   :  { %v274_v19 = vpop.f32.mrf.mxu1 }
 0x1bf   :  { %v275_v20 = vadd.f32 %v274_v19, %v235_v18 }
 0x1c0   :  { %v332_v21 = vpop.f32.mrf.mxu1 }
 0x1c1   :  { %280 = vst [vmem:[#allocation3] sm:$0x1] %v275_v20 }
 0x1c2   :  { %v277_v17 = vpop.f32.mrf.mxu1 }
 0x1c3   :  { %380 = shalt.err (!%p377_p4)
}
 0x1c4   :  { %290 = dma.vmem_to_hbm [thread:$0]  %s288_s20, 16, %s485_s5, [#allocation4]   ;;  %v333_v22 = vpop.f32.mrf.mxu1 }
 0x1c5   :  { %389 = dma.done.wait [#allocation4], 16  }
 0x1c6   :  { %390 = vsyncadd [#allocation4], 4294967280 }
 0x1c7   :  { %294 = vsyncpa [#allocation4], 1 }

</bundles_post_ra>
